<compile_context>
chip_gen: v6e
topology: v6e:2x2x1
jax: 0.10.0
libtpu: 0.0.40
codegen_flags: <defaults>
</compile_context>

<pallas_src>
import functools

import jax
import jax.numpy as jnp
from jax import lax
from jax.experimental import pallas as pl
from jax.experimental.pallas import tpu as pltpu


# ---------------------------------------------------------------------------
# Kernel 1: fc = Linear(no bias) + BatchNorm1d (folded affine) + GLU
# ---------------------------------------------------------------------------
def _fc_bn_glu_kernel(c_ref, z_ref, wc_ref, wz_ref, scale_ref, shift_ref, o_ref):
    # c_ref:(N,128) z_ref:(N,100) wc:(128,D2) wz:(100,D2) scale/shift:(1,D2) o:(N,D2//2)
    # concat(c, z) @ W.T is done as two matmuls (no concat needed).
    y = (jnp.dot(c_ref[...], wc_ref[...], preferred_element_type=jnp.float32) +
         jnp.dot(z_ref[...], wz_ref[...], preferred_element_type=jnp.float32))
    y = y * scale_ref[...] + shift_ref[...]          # BatchNorm1d (inference affine)
    d = y.shape[1] // 2
    o_ref[...] = (y[:, :d] * jax.nn.sigmoid(y[:, d:])).astype(o_ref.dtype)   # GLU


def _fc_bn_glu(c_code, z_code, w_fc, bn_scale, bn_shift):
    n, cdim = c_code.shape
    d2 = w_fc.shape[0]
    # PyTorch Linear weight is (out, in); split it by input block and transpose so the
    # matmul output dimension (d2) sits on the lane axis.
    wc = jnp.transpose(w_fc[:, :cdim], (1, 0))       # (128, D2)
    wz = jnp.transpose(w_fc[:, cdim:], (1, 0))       # (100, D2)
    return pl.pallas_call(
        _fc_bn_glu_kernel,
        out_shape=jax.ShapeDtypeStruct((n, d2 // 2), c_code.dtype),
        grid=(1,),
        in_specs=[
            pl.BlockSpec((n, cdim), lambda i: (0, 0)),
            pl.BlockSpec((n, z_code.shape[1]), lambda i: (0, 0)),
            pl.BlockSpec(wc.shape, lambda i: (0, 0)),
            pl.BlockSpec(wz.shape, lambda i: (0, 0)),
            pl.BlockSpec((1, d2), lambda i: (0, 0)),
            pl.BlockSpec((1, d2), lambda i: (0, 0)),
        ],
        out_specs=pl.BlockSpec((n, d2 // 2), lambda i: (0, 0)),
    )(c_code, z_code, wc, wz, bn_scale.reshape(1, d2), bn_shift.reshape(1, d2))


# ---------------------------------------------------------------------------
# Kernel 2: conv3x3 (stride1, pad1, no bias) + BatchNorm2d (folded) + GLU
#           on a (Cin, H*W)-flat block (channels on sublanes, spatial on lanes).
# ---------------------------------------------------------------------------
def _upblock_conv_bn_glu_kernel(x_ref, w_ref, scale_ref, shift_ref, o_ref, *, width):
    # x_ref:(1,Cin,L) upsampled activation, L = H*W flat    w_ref:(Cout2, 9*Cin)
    # scale/shift:(Cout2,1)                                  o_ref:(1, Cout2//2, L)
    cin = x_ref.shape[1]
    L = x_ref.shape[2]
    cout2 = w_ref.shape[0]
    cout = cout2 // 2
    w2 = width
    pad = w2 + 1

    x = x_ref[0]                                             # (Cin, L)
    zpad = jnp.zeros((cin, pad), jnp.float32)
    xp = jnp.concatenate([zpad, x.astype(jnp.float32), zpad], axis=1)   # (Cin, L + 2*pad)

    # Column-validity masks (output column j = p % width); rows are handled by the zero pads.
    j_idx = lax.broadcasted_iota(jnp.int32, (1, L), 1) % w2
    mask_l = (j_idx >= 1).astype(jnp.float32)                # tap column kx=0 (dx = -1)
    mask_r = (j_idx <= w2 - 2).astype(jnp.float32)           # tap column kx=2 (dx = +1)

    # Build all 9 shifted tap windows as contiguous lane-offset slices and fold them into the
    # contraction dim of ONE matmul (K = 9*Cin), keeping spatial lane-dense (N = L).
    taps = []
    for ky in range(3):
        for kx in range(3):
            d = (ky - 1) * w2 + (kx - 1)
            s = xp[:, pad + d: pad + d + L]                  # (Cin, L)
            if kx == 0:
                s = s * mask_l
            elif kx == 2:
                s = s * mask_r
            taps.append(s)
    rhs = jnp.concatenate(taps, axis=0)                      # (9*Cin, L)

    y = jnp.dot(w_ref[...], rhs, preferred_element_type=jnp.float32)   # (Cout2, L)
    y = y * scale_ref[...] + shift_ref[...]                  # BatchNorm2d (inference affine)
    g = y[:cout, :] * jax.nn.sigmoid(y[cout:, :])            # GLU over channel halves
    o_ref[0] = g.astype(o_ref.dtype)


def _upblock(x_nchw, w_oihw, bn_scale, bn_shift):
    n, cin, h, w = x_nchw.shape
    h2, w2 = 2 * h, 2 * w
    L = h2 * w2
    cout2 = w_oihw.shape[0]
    cout = cout2 // 2

    # nearest-neighbour 2x upsample (single XLA broadcast), then a FREE reshape to flat NCHW.
    xu = jnp.repeat(jnp.repeat(x_nchw, 2, axis=2), 2, axis=3)
    xu_flat = xu.reshape(n, cin, L)

    # OIHW -> (Cout2, 9*Cin), tap-major then cin: index = (ky*3+kx)*Cin + ci.
    w_folded = jnp.transpose(w_oihw, (0, 2, 3, 1)).reshape(cout2, 9 * cin)
    scale2 = bn_scale.reshape(cout2, 1).astype(jnp.float32)
    shift2 = bn_shift.reshape(cout2, 1).astype(jnp.float32)

    out_flat = pl.pallas_call(
        functools.partial(_upblock_conv_bn_glu_kernel, width=w2),
        out_shape=jax.ShapeDtypeStruct((n, cout, L), x_nchw.dtype),
        grid=(n,),
        in_specs=[
            pl.BlockSpec((1, cin, L), lambda i: (i, 0, 0)),
            pl.BlockSpec((cout2, 9 * cin), lambda i: (0, 0)),
            pl.BlockSpec((cout2, 1), lambda i: (0, 0)),
            pl.BlockSpec((cout2, 1), lambda i: (0, 0)),
        ],
        out_specs=pl.BlockSpec((1, cout, L), lambda i: (i, 0, 0)),
        compiler_params=pltpu.CompilerParams(dimension_semantics=("parallel",)),
    )(xu_flat, w_folded, scale2, shift2)
    return out_flat.reshape(n, cout, h2, w2)                 # free reshape back to NCHW


# ---------------------------------------------------------------------------
# INIT_STAGE_G forward
# ---------------------------------------------------------------------------
def init_stage_g_forward(z_code, c_code, params):
    """z_code:(N,100) c_code:(N,128) -> (N, ngf//16, 64, 64)"""
    n = z_code.shape[0]
    ngf = params['ngf']
    h = _fc_bn_glu(c_code, z_code, params['fc_w'], params['fc_scale'], params['fc_shift'])
    x = h.reshape(n, ngf, 4, 4)
    for name in ('up1', 'up2', 'up3', 'up4'):
        x = _upblock(x, params[name + '_w'], params[name + '_scale'], params[name + '_shift'])
    return x


def _fold_bn(gamma, beta, mean, var, eps=1e-5):
    scale = gamma * lax.rsqrt(var + eps)
    return scale, beta - mean * scale


# ---------------------------------------------------------------------------
# Pure-JAX reference (lax.conv) for the correctness check
# ---------------------------------------------------------------------------
def _reference_forward(z_code, c_code, params):
    ngf = params['ngf']
    n = z_code.shape[0]
    x = jnp.concatenate([c_code, z_code], axis=1)
    y = x @ params['fc_w'].T
    y = y * params['fc_scale'] + params['fc_shift']
    d = y.shape[1] // 2
    out = (y[:, :d] * jax.nn.sigmoid(y[:, d:])).reshape(n, ngf, 4, 4)
    for name in ('up1', 'up2', 'up3', 'up4'):
        out = jnp.repeat(jnp.repeat(out, 2, axis=2), 2, axis=3)
        out = lax.conv_general_dilated(
            out, params[name + '_w'], (1, 1), ((1, 1), (1, 1)),
            dimension_numbers=('NCHW', 'OIHW', 'NCHW'))
        sc, sh = params[name + '_scale'], params[name + '_shift']
        out = out * sc[None, :, None, None] + sh[None, :, None, None]
        cc = out.shape[1] // 2
        out = out[:, :cc] * jax.nn.sigmoid(out[:, cc:])
    return out


if __name__ == "__main__":
    key = jax.random.PRNGKey(0)
    N, ngf = 2, 32
    keys = iter(jax.random.split(key, 40))

    z_code = jax.random.normal(next(keys), (N, 100), jnp.float32)
    c_code = jax.random.normal(next(keys), (N, 128), jnp.float32)

    params = {'ngf': ngf}
    d2 = ngf * 32
    params['fc_w'] = jax.random.normal(next(keys), (d2, 228), jnp.float32) / jnp.sqrt(228.0)
    g = 1.0 + 0.1 * jax.random.normal(next(keys), (d2,), jnp.float32)
    b = 0.1 * jax.random.normal(next(keys), (d2,), jnp.float32)
    m = 0.1 * jax.random.normal(next(keys), (d2,), jnp.float32)
    v = jax.random.uniform(next(keys), (d2,), jnp.float32, 0.5, 1.5)
    params['fc_scale'], params['fc_shift'] = _fold_bn(g, b, m, v)

    cin = ngf
    for name in ('up1', 'up2', 'up3', 'up4'):
        cout2 = cin  # upBlock(in, in//2): conv3x3(in, (in//2)*2) -> Cout2 == Cin
        params[name + '_w'] = (jax.random.normal(next(keys), (cout2, cin, 3, 3), jnp.float32)
                               / jnp.sqrt(9.0 * cin))
        g = 1.0 + 0.1 * jax.random.normal(next(keys), (cout2,), jnp.float32)
        b = 0.1 * jax.random.normal(next(keys), (cout2,), jnp.float32)
        m = 0.1 * jax.random.normal(next(keys), (cout2,), jnp.float32)
        v = jax.random.uniform(next(keys), (cout2,), jnp.float32, 0.5, 1.5)
        params[name + '_scale'], params[name + '_shift'] = _fold_bn(g, b, m, v)
        cin = cout2 // 2

    out = jax.block_until_ready(init_stage_g_forward(z_code, c_code, params))
    assert out.shape == (N, ngf // 16, 64, 64), out.shape

    ref = jax.block_until_ready(_reference_forward(z_code, c_code, params))
    assert jnp.allclose(out, ref, atol=2e-4, rtol=2e-4), \
        float(jnp.max(jnp.abs(out - ref)))

    print("KERNEL_OK")
</pallas_src>

<mosaic_0001>
module attributes {stable_mosaic.version = 11 : i64} {
  func.func @_fc_bn_glu_kernel(%arg0: i32, %arg1: memref<2x128xf32, #tpu.memory_space<vmem>>, %arg2: memref<2x100xf32, #tpu.memory_space<vmem>>, %arg3: memref<128x1024xf32, #tpu.memory_space<vmem>>, %arg4: memref<100x1024xf32, #tpu.memory_space<vmem>>, %arg5: memref<1x1024xf32, #tpu.memory_space<vmem>>, %arg6: memref<1x1024xf32, #tpu.memory_space<vmem>>, %arg7: memref<2x512xf32, #tpu.memory_space<vmem>>) attributes {dimension_semantics = [#tpu.dimension_semantics<arbitrary>], iteration_bounds = array<i64: 1>, scalar_prefetch = 0 : i64, scratch_operands = 0 : i64, tpu.core_type = #tpu.core_type<tc>, window_params = [{pipeline_mode = #tpu.pipeline_mode<synchronous>, transform_indices = @transform_0, window_bounds = array<i64: 2, 128>}, {pipeline_mode = #tpu.pipeline_mode<synchronous>, transform_indices = @transform_1, window_bounds = array<i64: 2, 100>}, {pipeline_mode = #tpu.pipeline_mode<synchronous>, transform_indices = @transform_2, window_bounds = array<i64: 128, 1024>}, {pipeline_mode = #tpu.pipeline_mode<synchronous>, transform_indices = @transform_3, window_bounds = array<i64: 100, 1024>}, {pipeline_mode = #tpu.pipeline_mode<synchronous>, transform_indices = @transform_4, window_bounds = array<i64: 1, 1024>}, {pipeline_mode = #tpu.pipeline_mode<synchronous>, transform_indices = @transform_5, window_bounds = array<i64: 1, 1024>}, {pipeline_mode = #tpu.pipeline_mode<synchronous>, transform_indices = @transform_6, window_bounds = array<i64: 2, 512>}]} {
    %c0 = arith.constant 0 : index
    %c0_0 = arith.constant 0 : index
    %0 = vector.load %arg1[%c0, %c0_0] : memref<2x128xf32, #tpu.memory_space<vmem>>, vector<2x128xf32>
    %c0_1 = arith.constant 0 : index
    %c0_2 = arith.constant 0 : index
    %1 = vector.load %arg3[%c0_1, %c0_2] : memref<128x1024xf32, #tpu.memory_space<vmem>>, vector<128x1024xf32>
    %cst = arith.constant dense<0.000000e+00> : vector<2x1024xf32>
    %2 = tpu.matmul %0, %1, %cst {dimension_numbers = #tpu.dot_dimension_numbers<[1], [0], [0], [1], [0, 0, 1, 1], [], []>} : vector<2x128xf32>, vector<128x1024xf32>, vector<2x1024xf32> -> vector<2x1024xf32>
    %c0_3 = arith.constant 0 : index
    %c0_4 = arith.constant 0 : index
    %3 = vector.load %arg2[%c0_3, %c0_4] : memref<2x100xf32, #tpu.memory_space<vmem>>, vector<2x100xf32>
    %c0_5 = arith.constant 0 : index
    %c0_6 = arith.constant 0 : index
    %4 = vector.load %arg4[%c0_5, %c0_6] : memref<100x1024xf32, #tpu.memory_space<vmem>>, vector<100x1024xf32>
    %cst_7 = arith.constant dense<0.000000e+00> : vector<2x1024xf32>
    %5 = tpu.matmul %3, %4, %cst_7 {dimension_numbers = #tpu.dot_dimension_numbers<[1], [0], [0], [1], [0, 0, 1, 1], [], []>} : vector<2x100xf32>, vector<100x1024xf32>, vector<2x1024xf32> -> vector<2x1024xf32>
    %6 = arith.addf %2, %5 : vector<2x1024xf32>
    %c0_8 = arith.constant 0 : index
    %c0_9 = arith.constant 0 : index
    %7 = vector.load %arg5[%c0_8, %c0_9] : memref<1x1024xf32, #tpu.memory_space<vmem>>, vector<1x1024xf32>
    %8 = vector.broadcast %7 : vector<1x1024xf32> to vector<2x1024xf32>
    %9 = arith.mulf %6, %8 : vector<2x1024xf32>
    %c0_10 = arith.constant 0 : index
    %c0_11 = arith.constant 0 : index
    %10 = vector.load %arg6[%c0_10, %c0_11] : memref<1x1024xf32, #tpu.memory_space<vmem>>, vector<1x1024xf32>
    %11 = vector.broadcast %10 : vector<1x1024xf32> to vector<2x1024xf32>
    %12 = arith.addf %9, %11 : vector<2x1024xf32>
    %13 = vector.extract_strided_slice %12 {offsets = [0, 0], sizes = [2, 512], strides = [1, 1]} : vector<2x1024xf32> to vector<2x512xf32>
    %14 = vector.extract_strided_slice %12 {offsets = [0, 512], sizes = [2, 512], strides = [1, 1]} : vector<2x1024xf32> to vector<2x512xf32>
    %15 = arith.negf %14 : vector<2x512xf32>
    %16 = math.exp %15 : vector<2x512xf32>
    %cst_12 = arith.constant 1.000000e+00 : f32
    %17 = vector.broadcast %cst_12 : f32 to vector<2x512xf32>
    %18 = arith.addf %17, %16 : vector<2x512xf32>
    %19 = arith.divf %17, %18 : vector<2x512xf32>
    %20 = arith.mulf %13, %19 : vector<2x512xf32>
    %c0_13 = arith.constant 0 : index
    %c0_14 = arith.constant 0 : index
    %21 = vector.load %arg7[%c0_13, %c0_14] : memref<2x512xf32, #tpu.memory_space<vmem>>, vector<2x512xf32>
    tpu.vector_store %arg7[%c0_13, %c0_14], %20 {strides = array<i32>} : memref<2x512xf32, #tpu.memory_space<vmem>>, vector<2x512xf32>,
    return
  }
  func.func @transform_0(%arg0: i32) -> (i32, i32) {
    %c0_i32 = arith.constant 0 : i32
    %c0_i32_0 = arith.constant 0 : i32
    %c0_i32_1 = arith.constant 0 : i32
    return %c0_i32, %c0_i32_0 : i32, i32
  }
  func.func @transform_1(%arg0: i32) -> (i32, i32) {
    %c0_i32 = arith.constant 0 : i32
    %c0_i32_0 = arith.constant 0 : i32
    %c0_i32_1 = arith.constant 0 : i32
    return %c0_i32, %c0_i32_0 : i32, i32
  }
  func.func @transform_2(%arg0: i32) -> (i32, i32) {
    %c0_i32 = arith.constant 0 : i32
    %c0_i32_0 = arith.constant 0 : i32
    %c0_i32_1 = arith.constant 0 : i32
    return %c0_i32, %c0_i32_0 : i32, i32
  }
  func.func @transform_3(%arg0: i32) -> (i32, i32) {
    %c0_i32 = arith.constant 0 : i32
    %c0_i32_0 = arith.constant 0 : i32
    %c0_i32_1 = arith.constant 0 : i32
    return %c0_i32, %c0_i32_0 : i32, i32
  }
  func.func @transform_4(%arg0: i32) -> (i32, i32) {
    %c0_i32 = arith.constant 0 : i32
    %c0_i32_0 = arith.constant 0 : i32
    %c0_i32_1 = arith.constant 0 : i32
    return %c0_i32, %c0_i32_0 : i32, i32
  }
  func.func @transform_5(%arg0: i32) -> (i32, i32) {
    %c0_i32 = arith.constant 0 : i32
    %c0_i32_0 = arith.constant 0 : i32
    %c0_i32_1 = arith.constant 0 : i32
    return %c0_i32, %c0_i32_0 : i32, i32
  }
  func.func @transform_6(%arg0: i32) -> (i32, i32) {
    %c0_i32 = arith.constant 0 : i32
    %c0_i32_0 = arith.constant 0 : i32
    %c0_i32_1 = arith.constant 0 : i32
    return %c0_i32, %c0_i32_0 : i32, i32
  }
}

</mosaic_0001>

<bundles_post_ra>
// kernel: tpu_custom_call.1
= control target key start
LH: loop header
LB: loop body
LE: loop exit
PB: predicated region body
PF: predicated region fallthrough
CT: control target
= control target key end

     0   :  { %11 = vsyncpa [#allocation3], 0  ;;  %s1386_s0 = inlined_call_operand.hbm [shape: f32[2,128], index: 0, kind: input, shape index: {}]   ;;  %s1387_s1 = inlined_call_operand.hbm [shape: f32[2,100], index: 1, kind: input, shape index: {}]   ;;  %s1388_s2 = inlined_call_operand.hbm [shape: f32[128,1024], index: 2, kind: input, shape index: {}]   ;;  %s1389_s3 = inlined_call_operand.hbm [shape: f32[100,1024], index: 3, kind: input, shape index: {}]   ;;  %s1390_s4 = inlined_call_operand.hbm [shape: f32[1,1024], index: 4, kind: input, shape index: {}]   ;;  %s1391_s5 = inlined_call_operand.vmem [shape: f32[1,1024], index: 5, kind: input, shape index: {}]   ;;  %s1392_s6 = inlined_call_operand.hbm [shape: f32[2,512], index: 6, kind: output, shape index: {}]  }
   0x1   :  { %12 = vsyncpa [#allocation6], 0 }
   0x2   :  { %13 = vsyncpa [#allocation9], 0 }
   0x3   :  { %14 = vsyncpa [#allocation4], 0  ;;  %s1255_s21 = smov [#allocation5]  }
   0x4   :  { %s31_s22 = sshll.u32 %s1255_s21, 4  ;;  %s32_s22 = int_to_ptr.vmem [resolvable:$true] %s31_s22 }
   0x5   :  { %s1135_s23 = scalar_lea.vmem %s32_s22, 32  ;;  %p1140_p1 = scmp.lt.s32.totalorder %s32_s22, %s32_s22 }
   0x6   :  { %p1136_p0 = scmp.ne.s32.totalorder %s32_s22, %s1135_s23  ;;  %p1141_p2 = scmp.lt.s32.totalorder %s1135_s23, %s1135_s23 }
   0x8   :  { %p1142_p3 = por %p1141_p2, %p1140_p1 }
   0xa   :  { %p1143_p4 = pnand %p1142_p3, %p1136_p0 }
   0xc   :  { %1146 = shalt.err (!%p1143_p4)
}
   0xd   :  { %34 = dma.hbm_to_vmem [thread:$0]  %s1387_s1, 32, %s32_s22, [#allocation6]  }
   0xe   :  { %s1256_s26 = smov [#allocation8]   ;;  %s1257_s28 = smov [#allocation2]  }
   0xf   :  { %s52_s27 = sshll.u32 %s1256_s26, 4  ;;  %s21_s29 = sshll.u32 %s1257_s28, 4  ;;  %s53_s27 = int_to_ptr.vmem [resolvable:$true] %s52_s27  ;;  %s22_s29 = int_to_ptr.vmem [resolvable:$true] %s21_s29 }
  0x10   :  { %s1155_s30 = scalar_lea.vmem %s53_s27, 13312  ;;  %p1160_p6 = scmp.lt.s32.totalorder %s53_s27, %s53_s27 }
  0x11   :  { %p1156_p5 = scmp.ne.s32.totalorder %s53_s27, %s1155_s30  ;;  %p1161_p7 = scmp.lt.s32.totalorder %s1155_s30, %s1155_s30 }
  0x13   :  { %p1162_p8 = por %p1161_p7, %p1160_p6 }
  0x15   :  { %p1163_p9 = pnand %p1162_p8, %p1156_p5 }
  0x17   :  { %1166 = shalt.err (!%p1163_p9)
}
  0x18   :  { %s1258_s7 = smov 1024   ;;  %s1259_s8 = smov 64  }
  0x19   :  { %58 = dma.hbm_to_vmem [thread:$0]  %s1389_s3, 13312, %s53_s27, [#allocation9], %s1258_s7, %s1258_s7, %s1259_s8  }
  0x1a   :  { %s1175_s1 = scalar_lea.vmem %s22_s29, 32  ;;  %p1180_p11 = scmp.lt.s32.totalorder %s22_s29, %s22_s29 }
  0x1b   :  { %p1176_p10 = scmp.ne.s32.totalorder %s22_s29, %s1175_s1  ;;  %p1181_p12 = scmp.lt.s32.totalorder %s1175_s1, %s1175_s1 }
  0x1d   :  { %p1182_p13 = por %p1181_p12, %p1180_p11 }
  0x1f   :  { %p1183_p0 = pnand %p1182_p13, %p1176_p10 }
  0x21   :  { %1186 = shalt.err (!%p1183_p0)
}
  0x22   :  { %24 = dma.hbm_to_vmem [thread:$0]  %s1386_s0, 32, %s22_s29, [#allocation3]  }
  0x23   :  { %s1260_s13 = smov [#allocation7]   ;;  %s1261_s15 = smov [#allocation10]  }
  0x24   :  { %s40_s14 = sshll.u32 %s1260_s13, 4  ;;  %s65_s16 = sshll.u32 %s1261_s15, 4  ;;  %s41_s14 = int_to_ptr.vmem [resolvable:$true] %s40_s14  ;;  %s66_s16 = int_to_ptr.vmem [resolvable:$true] %s65_s16 }
  0x25   :  { %s1195_s17 = scalar_lea.vmem %s41_s14, 16384  ;;  %p1200_p2 = scmp.lt.s32.totalorder %s41_s14, %s41_s14 }
  0x26   :  { %p1196_p1 = scmp.ne.s32.totalorder %s41_s14, %s1195_s17  ;;  %p1201_p3 = scmp.lt.s32.totalorder %s1195_s17, %s1195_s17 }
  0x28   :  { %p1202_p4 = por %p1201_p3, %p1200_p2 }
  0x2a   :  { %p1203_p5 = pnand %p1202_p4, %p1196_p1 }
  0x2c   :  { %1206 = shalt.err (!%p1203_p5)
}
  0x2d   :  { %46 = dma.hbm_to_vmem [thread:$0]  %s1388_s2, 16384, %s41_s14, [#allocation6], %s1258_s7, %s1258_s7, %s1259_s8  }
  0x2e   :  { %s1215_s19 = scalar_lea.vmem %s66_s16, 128  ;;  %p1220_p7 = scmp.lt.s32.totalorder %s66_s16, %s66_s16 }
  0x2f   :  { %p1216_p6 = scmp.ne.s32.totalorder %s66_s16, %s1215_s19  ;;  %p1221_p8 = scmp.lt.s32.totalorder %s1215_s19, %s1215_s19 }
  0x31   :  { %p1222_p9 = por %p1221_p8, %p1220_p7 }
  0x33   :  { %p1223_p10 = pnand %p1222_p9, %p1216_p6 }
  0x35   :  { %1226 = shalt.err (!%p1223_p10)
}
  0x36   :  { %68 = dma.hbm_to_vmem [thread:$0]  %s1390_s4, 128, %s66_s16, [#allocation9]  }
  0x37   :  { %1247 = dma.done.wait [#allocation3], 32  }
  0x38   :  { %1248 = vsyncadd [#allocation3], 4294967264 }
  0x39   :  { %1249 = dma.done.wait [#allocation6], 16416  }
  0x3a   :  { %1250 = vsyncadd [#allocation6], 4294950880 }
  0x3b   :  { %1251 = dma.done.wait [#allocation9], 13440  }
  0x3c   :  { %1252 = vsyncadd [#allocation9], 4294953856  ;;  %v1262_v0 = vmov 0.0   ;;  %vm324_vm0 = vcmask 1043456   ;;  %v313_v1 = vld [vmem:[#allocation8 + $0x308] sm:$0xf] }
  0x3d   :  { %413 = vmatprep.mubr.f32.mxu0 %v1262_v0  ;;  %484 = vmatprep.mubr.f32.mxu1 %v1262_v0  ;;  %v315_v2 = vld [vmem:[#allocation8 + $0x318] sm:$0xf]  ;;  %v312_v3 = vld [vmem:[#allocation8 + $0x300] sm:$0xf]  ;;  %v314_v4 = vld [vmem:[#allocation8 + $0x310] sm:$0xf] }
  0x3e   :  { %1085 = vmatprep.subr.msk.mxu0 %vm324_vm0, %v313_v1  ;;  %1088 = vmatprep.subr.msk.mxu1 %vm324_vm0, %v315_v2  ;;  %v305_v5 = vld [vmem:[#allocation8 + $0x2c8] sm:$0xff]  ;;  %v307_v6 = vld [vmem:[#allocation8 + $0x2d8] sm:$0xff]  ;;  %v304_v7 = vld [vmem:[#allocation8 + $0x2c0] sm:$0xff]  ;;  %vm320_vm1 = vcmask 818176  }
  0x3f   :  { %1086 = vmatpush1.msk.msra.mxu0 %vm324_vm0, %v312_v3  ;;  %1089 = vmatpush1.msk.msra.mxu1 %vm324_vm0, %v314_v4  ;;  %v306_v8 = vld [vmem:[#allocation8 + $0x2d0] sm:$0xff]  ;;  %v297_v9 = vld [vmem:[#allocation8 + $0x288] sm:$0xff]  ;;  %v299_v10 = vld [vmem:[#allocation8 + $0x298] sm:$0xff] }
  0x40   :  { %357 = vmatprep.subr.mxu0 %v305_v5  ;;  %428 = vmatprep.subr.mxu1 %v307_v6  ;;  %v296_v11 = vld [vmem:[#allocation8 + $0x280] sm:$0xff]  ;;  %v298_v12 = vld [vmem:[#allocation8 + $0x290] sm:$0xff]  ;;  %v289_v13 = vld [vmem:[#allocation8 + $0x248] sm:$0xff] }
  0x41   :  { %358 = vmatpush1.msra.mxu0 %v304_v7  ;;  %429 = vmatpush1.msra.mxu1 %v306_v8  ;;  %v291_v14 = vld [vmem:[#allocation8 + $0x258] sm:$0xff]  ;;  %v288_v15 = vld [vmem:[#allocation8 + $0x240] sm:$0xff]  ;;  %v290_v16 = vld [vmem:[#allocation8 + $0x250] sm:$0xff] }
  0x42   :  { %359 = vmatprep.subr.mxu0 %v297_v9  ;;  %430 = vmatprep.subr.mxu1 %v299_v10  ;;  %v281_v17 = vld [vmem:[#allocation8 + $0x208] sm:$0xff]  ;;  %v283_v18 = vld [vmem:[#allocation8 + $0x218] sm:$0xff]  ;;  %v280_v19 = vld [vmem:[#allocation8 + $0x200] sm:$0xff] }
  0x43   :  { %360 = vmatpush1.msra.mxu0 %v296_v11  ;;  %431 = vmatpush1.msra.mxu1 %v298_v12  ;;  %v282_v20 = vld [vmem:[#allocation8 + $0x210] sm:$0xff]  ;;  %v273_v21 = vld [vmem:[#allocation8 + $0x1c8] sm:$0xff]  ;;  %v275_v22 = vld [vmem:[#allocation8 + $0x1d8] sm:$0xff] }
  0x44   :  { %361 = vmatprep.subr.mxu0 %v289_v13  ;;  %432 = vmatprep.subr.mxu1 %v291_v14  ;;  %v272_v23 = vld [vmem:[#allocation8 + $0x1c0] sm:$0xff]  ;;  %v274_v24 = vld [vmem:[#allocation8 + $0x1d0] sm:$0xff]  ;;  %v265_v25 = vld [vmem:[#allocation8 + $0x188] sm:$0xff] }
  0x45   :  { %362 = vmatpush1.msra.mxu0 %v288_v15  ;;  %433 = vmatpush1.msra.mxu1 %v290_v16  ;;  %v267_v26 = vld [vmem:[#allocation8 + $0x198] sm:$0xff]  ;;  %v264_v27 = vld [vmem:[#allocation8 + $0x180] sm:$0xff]  ;;  %v266_v28 = vld [vmem:[#allocation8 + $0x190] sm:$0xff] }
  0x46   :  { %363 = vmatprep.subr.mxu0 %v281_v17  ;;  %434 = vmatprep.subr.mxu1 %v283_v18  ;;  %v257_v29 = vld [vmem:[#allocation8 + $0x148] sm:$0xff]  ;;  %v259_v30 = vld [vmem:[#allocation8 + $0x158] sm:$0xff]  ;;  %v256_v31 = vld [vmem:[#allocation8 + $0x140] sm:$0xff] }
  0x47   :  { %364 = vmatpush1.msra.mxu0 %v280_v19  ;;  %435 = vmatpush1.msra.mxu1 %v282_v20  ;;  %v258_v32 = vld [vmem:[#allocation8 + $0x150] sm:$0xff]  ;;  %v249_v33 = vld [vmem:[#allocation8 + $0x108] sm:$0xff]  ;;  %v251_v34 = vld [vmem:[#allocation8 + $0x118] sm:$0xff] }
  0x48   :  { %365 = vmatprep.subr.mxu0 %v273_v21  ;;  %436 = vmatprep.subr.mxu1 %v275_v22  ;;  %v248_v35 = vld [vmem:[#allocation8 + $0x100] sm:$0xff]  ;;  %v250_v36 = vld [vmem:[#allocation8 + $0x110] sm:$0xff]  ;;  %v241_v37 = vld [vmem:[#allocation8 + $0xc8] sm:$0xff] }
  0x49   :  { %366 = vmatpush1.msra.mxu0 %v272_v23  ;;  %437 = vmatpush1.msra.mxu1 %v274_v24  ;;  %v243_v38 = vld [vmem:[#allocation8 + $0xd8] sm:$0xff]  ;;  %v240_v39 = vld [vmem:[#allocation8 + $0xc0] sm:$0xff]  ;;  %v242_v40 = vld [vmem:[#allocation8 + $0xd0] sm:$0xff] }
  0x4a   :  { %367 = vmatprep.subr.mxu0 %v265_v25  ;;  %438 = vmatprep.subr.mxu1 %v267_v26  ;;  %v233_v41 = vld [vmem:[#allocation8 + $0x88] sm:$0xff]  ;;  %v235_v42 = vld [vmem:[#allocation8 + $0x98] sm:$0xff]  ;;  %v232_v43 = vld [vmem:[#allocation8 + $0x80] sm:$0xff] }
  0x4b   :  { %368 = vmatpush1.msra.mxu0 %v264_v27  ;;  %439 = vmatpush1.msra.mxu1 %v266_v28  ;;  %v234_v44 = vld [vmem:[#allocation8 + $0x90] sm:$0xff]  ;;  %v225_v45 = vld [vmem:[#allocation8 + $0x48] sm:$0xff]  ;;  %v227_v46 = vld [vmem:[#allocation8 + $0x58] sm:$0xff] }
  0x4c   :  { %369 = vmatprep.subr.mxu0 %v257_v29  ;;  %440 = vmatprep.subr.mxu1 %v259_v30  ;;  %v224_v47 = vld [vmem:[#allocation8 + $0x40] sm:$0xff]  ;;  %v226_v48 = vld [vmem:[#allocation8 + $0x50] sm:$0xff]  ;;  %v217_v49 = vld [vmem:[#allocation8 + $0x8] sm:$0xff] }
  0x4d   :  { %370 = vmatpush1.msra.mxu0 %v256_v31  ;;  %441 = vmatpush1.msra.mxu1 %v258_v32  ;;  %v219_v50 = vld [vmem:[#allocation8 + $0x18] sm:$0xff]  ;;  %v216_v51 = vld [vmem:[#allocation8] sm:$0xff]  ;;  %v218_v52 = vld [vmem:[#allocation8 + $0x10] sm:$0xff] }
  0x4e   :  { %371 = vmatprep.subr.mxu0 %v249_v33  ;;  %442 = vmatprep.subr.mxu1 %v251_v34  ;;  %v1321_v53 = vld [vmem:[#allocation5] sm:$0x3]  ;;  %v317_v54 = vld [vmem:[#allocation8 + $0x328] sm:$0xf]  ;;  %v319_v55 = vld [vmem:[#allocation8 + $0x338] sm:$0xf] }
  0x4f   :  { %372 = vmatpush1.msra.mxu0 %v248_v35  ;;  %443 = vmatpush1.msra.mxu1 %v250_v36  ;;  %v316_v56 = vld [vmem:[#allocation8 + $0x320] sm:$0xf]  ;;  %v318_v57 = vld [vmem:[#allocation8 + $0x330] sm:$0xf]  ;;  %v309_v58 = vld [vmem:[#allocation8 + $0x2e8] sm:$0xff] }
  0x50   :  { %373 = vmatprep.subr.mxu0 %v241_v37  ;;  %444 = vmatprep.subr.mxu1 %v243_v38  ;;  %v311_v59 = vld [vmem:[#allocation8 + $0x2f8] sm:$0xff]  ;;  %v308_v60 = vld [vmem:[#allocation8 + $0x2e0] sm:$0xff]  ;;  %v310_v61 = vld [vmem:[#allocation8 + $0x2f0] sm:$0xff] }
  0x51   :  { %374 = vmatpush1.msra.mxu0 %v240_v39  ;;  %445 = vmatpush1.msra.mxu1 %v242_v40  ;;  %v301_v62 = vld [vmem:[#allocation8 + $0x2a8] sm:$0xff]  ;;  %v303_v63 = vld [vmem:[#allocation8 + $0x2b8] sm:$0xff]  ;;  %v300_v1 = vld [vmem:[#allocation8 + $0x2a0] sm:$0xff] }
  0x52   :  { %375 = vmatprep.subr.mxu0 %v233_v41  ;;  %446 = vmatprep.subr.mxu1 %v235_v42  ;;  %v302_v2 = vld [vmem:[#allocation8 + $0x2b0] sm:$0xff]  ;;  %v293_v3 = vld [vmem:[#allocation8 + $0x268] sm:$0xff]  ;;  %v295_v4 = vld [vmem:[#allocation8 + $0x278] sm:$0xff] }
  0x53   :  { %376 = vmatpush1.msra.mxu0 %v232_v43  ;;  %447 = vmatpush1.msra.mxu1 %v234_v44  ;;  %v292_v5 = vld [vmem:[#allocation8 + $0x260] sm:$0xff]  ;;  %v294_v6 = vld [vmem:[#allocation8 + $0x270] sm:$0xff]  ;;  %v285_v7 = vld [vmem:[#allocation8 + $0x228] sm:$0xff] }
  0x54   :  { %377 = vmatprep.subr.mxu0 %v225_v45  ;;  %448 = vmatprep.subr.mxu1 %v227_v46  ;;  %v287_v8 = vld [vmem:[#allocation8 + $0x238] sm:$0xff]  ;;  %v284_v9 = vld [vmem:[#allocation8 + $0x220] sm:$0xff]  ;;  %v286_v10 = vld [vmem:[#allocation8 + $0x230] sm:$0xff] }
  0x55   :  { %378 = vmatpush1.msra.mxu0 %v224_v47  ;;  %449 = vmatpush1.msra.mxu1 %v226_v48  ;;  %v277_v11 = vld [vmem:[#allocation8 + $0x1e8] sm:$0xff]  ;;  %v279_v12 = vld [vmem:[#allocation8 + $0x1f8] sm:$0xff]  ;;  %v276_v13 = vld [vmem:[#allocation8 + $0x1e0] sm:$0xff] }
  0x56   :  { %379 = vmatprep.subr.mxu0 %v217_v49  ;;  %450 = vmatprep.subr.mxu1 %v219_v50  ;;  %v278_v14 = vld [vmem:[#allocation8 + $0x1f0] sm:$0xff]  ;;  %v269_v15 = vld [vmem:[#allocation8 + $0x1a8] sm:$0xff]  ;;  %v271_v16 = vld [vmem:[#allocation8 + $0x1b8] sm:$0xff] }
  0x57   :  { %380 = vmatpush1.msra.mxu0 %v216_v51  ;;  %451 = vmatpush1.msra.mxu1 %v218_v52  ;;  %v268_v17 = vld [vmem:[#allocation8 + $0x1a0] sm:$0xff]  ;;  %v270_v18 = vld [vmem:[#allocation8 + $0x1b0] sm:$0xff]  ;;  %v261_v19 = vld [vmem:[#allocation8 + $0x168] sm:$0xff] }
  0x58   :  { %1087 = vmatmul.mubr.msk.f32.vlgmr.msra.gmra.mxu0 %vm320_vm1, %v1321_v53  ;;  %1090 = vmatmul.mubr.msk.f32.vlgmr.msra.gmra.mxu1 %vm320_vm1, %v1321_v53  ;;  %v263_v20 = vld [vmem:[#allocation8 + $0x178] sm:$0xff]  ;;  %v260_v21 = vld [vmem:[#allocation8 + $0x160] sm:$0xff]  ;;  %v262_v22 = vld [vmem:[#allocation8 + $0x170] sm:$0xff] }
  0x59   :  { %1091 = vmatprep.subr.msk.mxu0 %vm324_vm0, %v317_v54  ;;  %1094 = vmatprep.subr.msk.mxu1 %vm324_vm0, %v319_v55  ;;  %v253_v23 = vld [vmem:[#allocation8 + $0x128] sm:$0xff]  ;;  %v255_v24 = vld [vmem:[#allocation8 + $0x138] sm:$0xff]  ;;  %v252_v25 = vld [vmem:[#allocation8 + $0x120] sm:$0xff] }
  0x5a   :  { %1092 = vmatpush1.msk.msra.mxu0 %vm324_vm0, %v316_v56  ;;  %1095 = vmatpush1.msk.msra.mxu1 %vm324_vm0, %v318_v57  ;;  %v254_v26 = vld [vmem:[#allocation8 + $0x130] sm:$0xff]  ;;  %v245_v27 = vld [vmem:[#allocation8 + $0xe8] sm:$0xff]  ;;  %v247_v28 = vld [vmem:[#allocation8 + $0xf8] sm:$0xff] }
  0x5b   :  { %499 = vmatprep.subr.mxu0 %v309_v58  ;;  %570 = vmatprep.subr.mxu1 %v311_v59  ;;  %v244_v29 = vld [vmem:[#allocation8 + $0xe0] sm:$0xff]  ;;  %v246_v30 = vld [vmem:[#allocation8 + $0xf0] sm:$0xff]  ;;  %v237_v31 = vld [vmem:[#allocation8 + $0xa8] sm:$0xff] }
  0x5c   :  { %500 = vmatpush1.msra.mxu0 %v308_v60  ;;  %571 = vmatpush1.msra.mxu1 %v310_v61  ;;  %v239_v32 = vld [vmem:[#allocation8 + $0xb8] sm:$0xff]  ;;  %v236_v33 = vld [vmem:[#allocation8 + $0xa0] sm:$0xff]  ;;  %v238_v34 = vld [vmem:[#allocation8 + $0xb0] sm:$0xff] }
  0x5d   :  { %501 = vmatprep.subr.mxu0 %v301_v62  ;;  %572 = vmatprep.subr.mxu1 %v303_v63  ;;  %v229_v35 = vld [vmem:[#allocation8 + $0x68] sm:$0xff]  ;;  %v231_v36 = vld [vmem:[#allocation8 + $0x78] sm:$0xff]  ;;  %v228_v37 = vld [vmem:[#allocation8 + $0x60] sm:$0xff] }
  0x5e   :  { %502 = vmatpush1.msra.mxu0 %v300_v1  ;;  %573 = vmatpush1.msra.mxu1 %v302_v2  ;;  %v230_v38 = vld [vmem:[#allocation8 + $0x70] sm:$0xff]  ;;  %v221_v39 = vld [vmem:[#allocation8 + $0x28] sm:$0xff]  ;;  %v223_v40 = vld [vmem:[#allocation8 + $0x38] sm:$0xff] }
  0x5f   :  { %503 = vmatprep.subr.mxu0 %v293_v3  ;;  %574 = vmatprep.subr.mxu1 %v295_v4  ;;  %v220_v41 = vld [vmem:[#allocation8 + $0x20] sm:$0xff]  ;;  %v222_v42 = vld [vmem:[#allocation8 + $0x30] sm:$0xff]  ;;  %v208_v43 = vld [vmem:[#allocation7 + $0x3c8] sm:$0xff] }
  0x60   :  { %504 = vmatpush1.msra.mxu0 %v292_v5  ;;  %575 = vmatpush1.msra.mxu1 %v294_v6  ;;  %v210_v44 = vld [vmem:[#allocation7 + $0x3d8] sm:$0xff]  ;;  %v207_v45 = vld [vmem:[#allocation7 + $0x3c0] sm:$0xff]  ;;  %v209_v46 = vld [vmem:[#allocation7 + $0x3d0] sm:$0xff] }
  0x61   :  { %505 = vmatprep.subr.mxu0 %v285_v7  ;;  %576 = vmatprep.subr.mxu1 %v287_v8  ;;  %v200_v47 = vld [vmem:[#allocation7 + $0x388] sm:$0xff]  ;;  %v202_v48 = vld [vmem:[#allocation7 + $0x398] sm:$0xff]  ;;  %v199_v49 = vld [vmem:[#allocation7 + $0x380] sm:$0xff] }
  0x62   :  { %506 = vmatpush1.msra.mxu0 %v284_v9  ;;  %577 = vmatpush1.msra.mxu1 %v286_v10  ;;  %v201_v50 = vld [vmem:[#allocation7 + $0x390] sm:$0xff]  ;;  %v192_v51 = vld [vmem:[#allocation7 + $0x348] sm:$0xff]  ;;  %v194_v52 = vld [vmem:[#allocation7 + $0x358] sm:$0xff] }
  0x63   :  { %507 = vmatprep.subr.mxu0 %v277_v11  ;;  %578 = vmatprep.subr.mxu1 %v279_v12  ;;  %v191_v54 = vld [vmem:[#allocation7 + $0x340] sm:$0xff]  ;;  %v193_v55 = vld [vmem:[#allocation7 + $0x350] sm:$0xff]  ;;  %v184_v56 = vld [vmem:[#allocation7 + $0x308] sm:$0xff] }
  0x64   :  { %508 = vmatpush1.msra.mxu0 %v276_v13  ;;  %579 = vmatpush1.msra.mxu1 %v278_v14  ;;  %v186_v57 = vld [vmem:[#allocation7 + $0x318] sm:$0xff]  ;;  %v185_v58 = vld [vmem:[#allocation7 + $0x310] sm:$0xff]  ;;  %v176_v59 = vld [vmem:[#allocation7 + $0x2c8] sm:$0xff] }
  0x65   :  { %509 = vmatprep.subr.mxu0 %v269_v15  ;;  %580 = vmatprep.subr.mxu1 %v271_v16  ;;  %v178_v60 = vld [vmem:[#allocation7 + $0x2d8] sm:$0xff]  ;;  %v175_v61 = vld [vmem:[#allocation7 + $0x2c0] sm:$0xff]  ;;  %v177_v62 = vld [vmem:[#allocation7 + $0x2d0] sm:$0xff] }
  0x66   :  { %510 = vmatpush1.msra.mxu0 %v268_v17  ;;  %581 = vmatpush1.msra.mxu1 %v270_v18  ;;  %v168_v63 = vld [vmem:[#allocation7 + $0x288] sm:$0xff]  ;;  %v170_v1 = vld [vmem:[#allocation7 + $0x298] sm:$0xff]  ;;  %v167_v2 = vld [vmem:[#allocation7 + $0x280] sm:$0xff] }
  0x67   :  { %511 = vmatprep.subr.mxu0 %v261_v19  ;;  %582 = vmatprep.subr.mxu1 %v263_v20  ;;  %v169_v3 = vld [vmem:[#allocation7 + $0x290] sm:$0xff]  ;;  %v160_v4 = vld [vmem:[#allocation7 + $0x248] sm:$0xff]  ;;  %v162_v5 = vld [vmem:[#allocation7 + $0x258] sm:$0xff] }
  0x68   :  { %512 = vmatpush1.msra.mxu0 %v260_v21  ;;  %583 = vmatpush1.msra.mxu1 %v262_v22  ;;  %v159_v6 = vld [vmem:[#allocation7 + $0x240] sm:$0xff]  ;;  %v161_v7 = vld [vmem:[#allocation7 + $0x250] sm:$0xff]  ;;  %v152_v8 = vld [vmem:[#allocation7 + $0x208] sm:$0xff] }
  0x69   :  { %513 = vmatprep.subr.mxu0 %v253_v23  ;;  %584 = vmatprep.subr.mxu1 %v255_v24  ;;  %v154_v9 = vld [vmem:[#allocation7 + $0x218] sm:$0xff]  ;;  %v151_v10 = vld [vmem:[#allocation7 + $0x200] sm:$0xff]  ;;  %v153_v11 = vld [vmem:[#allocation7 + $0x210] sm:$0xff] }
  0x6a   :  { %514 = vmatpush1.msra.mxu0 %v252_v25  ;;  %585 = vmatpush1.msra.mxu1 %v254_v26  ;;  %v144_v12 = vld [vmem:[#allocation7 + $0x1c8] sm:$0xff]  ;;  %v146_v13 = vld [vmem:[#allocation7 + $0x1d8] sm:$0xff]  ;;  %v143_v14 = vld [vmem:[#allocation7 + $0x1c0] sm:$0xff] }
  0x6b   :  { %515 = vmatprep.subr.mxu0 %v245_v27  ;;  %586 = vmatprep.subr.mxu1 %v247_v28  ;;  %v145_v15 = vld [vmem:[#allocation7 + $0x1d0] sm:$0xff]  ;;  %v136_v16 = vld [vmem:[#allocation7 + $0x188] sm:$0xff]  ;;  %v138_v17 = vld [vmem:[#allocation7 + $0x198] sm:$0xff] }
  0x6c   :  { %516 = vmatpush1.msra.mxu0 %v244_v29  ;;  %587 = vmatpush1.msra.mxu1 %v246_v30  ;;  %v135_v18 = vld [vmem:[#allocation7 + $0x180] sm:$0xff]  ;;  %v137_v19 = vld [vmem:[#allocation7 + $0x190] sm:$0xff]  ;;  %v128_v20 = vld [vmem:[#allocation7 + $0x148] sm:$0xff] }
  0x6d   :  { %517 = vmatprep.subr.mxu0 %v237_v31  ;;  %588 = vmatprep.subr.mxu1 %v239_v32  ;;  %v130_v21 = vld [vmem:[#allocation7 + $0x158] sm:$0xff]  ;;  %v127_v22 = vld [vmem:[#allocation7 + $0x140] sm:$0xff]  ;;  %v129_v23 = vld [vmem:[#allocation7 + $0x150] sm:$0xff] }
  0x6e   :  { %518 = vmatpush1.msra.mxu0 %v236_v33  ;;  %589 = vmatpush1.msra.mxu1 %v238_v34  ;;  %v120_v24 = vld [vmem:[#allocation7 + $0x108] sm:$0xff]  ;;  %v122_v25 = vld [vmem:[#allocation7 + $0x118] sm:$0xff]  ;;  %v119_v26 = vld [vmem:[#allocation7 + $0x100] sm:$0xff] }
  0x6f   :  { %519 = vmatprep.subr.mxu0 %v229_v35  ;;  %590 = vmatprep.subr.mxu1 %v231_v36  ;;  %v121_v27 = vld [vmem:[#allocation7 + $0x110] sm:$0xff]  ;;  %v112_v28 = vld [vmem:[#allocation7 + $0xc8] sm:$0xff]  ;;  %v114_v29 = vld [vmem:[#allocation7 + $0xd8] sm:$0xff] }
  0x70   :  { %520 = vmatpush1.msra.mxu0 %v228_v37  ;;  %591 = vmatpush1.msra.mxu1 %v230_v38  ;;  %v111_v30 = vld [vmem:[#allocation7 + $0xc0] sm:$0xff]  ;;  %v113_v31 = vld [vmem:[#allocation7 + $0xd0] sm:$0xff]  ;;  %v104_v32 = vld [vmem:[#allocation7 + $0x88] sm:$0xff] }
  0x71   :  { %521 = vmatprep.subr.mxu0 %v221_v39  ;;  %592 = vmatprep.subr.mxu1 %v223_v40  ;;  %v106_v33 = vld [vmem:[#allocation7 + $0x98] sm:$0xff]  ;;  %v103_v34 = vld [vmem:[#allocation7 + $0x80] sm:$0xff]  ;;  %v105_v35 = vld [vmem:[#allocation7 + $0x90] sm:$0xff] }
  0x72   :  { %522 = vmatpush1.msra.mxu0 %v220_v41  ;;  %555 = vmatprep.mubr.f32.mxu0 %v1262_v0  ;;  %v96_v36 = vld [vmem:[#allocation7 + $0x48] sm:$0xff]  ;;  %v98_v37 = vld [vmem:[#allocation7 + $0x58] sm:$0xff]  ;;  %v95_v38 = vld [vmem:[#allocation7 + $0x40] sm:$0xff] }
  0x73   :  { %593 = vmatpush1.msra.mxu1 %v222_v42  ;;  %626 = vmatprep.mubr.f32.mxu1 %v1262_v0  ;;  %v97_v39 = vld [vmem:[#allocation7 + $0x50] sm:$0xff]  ;;  %v88_v40 = vld [vmem:[#allocation7 + $0x8] sm:$0xff]  ;;  %v90_v41 = vld [vmem:[#allocation7 + $0x18] sm:$0xff] }
  0x74   :  { %1093 = vmatmul.mubr.msk.f32.vlgmr.msra.gmra.mxu0 %vm320_vm1, %v1321_v53  ;;  %1096 = vmatmul.mubr.msk.f32.vlgmr.msra.gmra.mxu1 %vm320_vm1, %v1321_v53  ;;  %v183_v53 = vld [vmem:[#allocation7 + $0x300] sm:$0xff] }
  0x75   :  { %633 = vmatprep.subr.mxu0 %v208_v43  ;;  %704 = vmatprep.subr.mxu1 %v210_v44  ;;  %v87_v42 = vld [vmem:[#allocation7] sm:$0xff]  ;;  %v89_v43 = vld [vmem:[#allocation7 + $0x10] sm:$0xff]  ;;  %v1337_v44 = vld [vmem:[#allocation2] sm:$0x3] }
  0x76   :  { %634 = vmatpush1.msra.mxu0 %v207_v45  ;;  %705 = vmatpush1.msra.mxu1 %v209_v46  ;;  %v212_v45 = vld [vmem:[#allocation7 + $0x3e8] sm:$0xff]  ;;  %v214_v46 = vld [vmem:[#allocation7 + $0x3f8] sm:$0xff] }
  0x77   :  { %635 = vmatprep.subr.mxu0 %v200_v47  ;;  %706 = vmatprep.subr.mxu1 %v202_v48  ;;  %v211_v47 = vld [vmem:[#allocation7 + $0x3e0] sm:$0xff]  ;;  %v213_v48 = vld [vmem:[#allocation7 + $0x3f0] sm:$0xff] }
  0x78   :  { %636 = vmatpush1.msra.mxu0 %v199_v49  ;;  %707 = vmatpush1.msra.mxu1 %v201_v50  ;;  %v204_v49 = vld [vmem:[#allocation7 + $0x3a8] sm:$0xff]  ;;  %v206_v50 = vld [vmem:[#allocation7 + $0x3b8] sm:$0xff] }
  0x79   :  { %637 = vmatprep.subr.mxu0 %v192_v51  ;;  %708 = vmatprep.subr.mxu1 %v194_v52  ;;  %v203_v51 = vld [vmem:[#allocation7 + $0x3a0] sm:$0xff]  ;;  %v205_v52 = vld [vmem:[#allocation7 + $0x3b0] sm:$0xff] }
  0x7a   :  { %638 = vmatpush1.msra.mxu0 %v191_v54  ;;  %709 = vmatpush1.msra.mxu1 %v193_v55  ;;  %v196_v54 = vld [vmem:[#allocation7 + $0x368] sm:$0xff]  ;;  %v198_v55 = vld [vmem:[#allocation7 + $0x378] sm:$0xff] }
  0x7b   :  { %639 = vmatprep.subr.mxu0 %v184_v56  ;;  %710 = vmatprep.subr.mxu1 %v186_v57  ;;  %v195_v56 = vld [vmem:[#allocation7 + $0x360] sm:$0xff]  ;;  %v197_v57 = vld [vmem:[#allocation7 + $0x370] sm:$0xff] }
  0x7c   :  { %640 = vmatpush1.msra.mxu0 %v183_v53  ;;  %711 = vmatpush1.msra.mxu1 %v185_v58  ;;  %v188_v53 = vld [vmem:[#allocation7 + $0x328] sm:$0xff]  ;;  %v190_v58 = vld [vmem:[#allocation7 + $0x338] sm:$0xff] }
  0x7d   :  { %641 = vmatprep.subr.mxu0 %v176_v59  ;;  %712 = vmatprep.subr.mxu1 %v178_v60  ;;  %v187_v59 = vld [vmem:[#allocation7 + $0x320] sm:$0xff]  ;;  %v189_v60 = vld [vmem:[#allocation7 + $0x330] sm:$0xff] }
  0x7e   :  { %642 = vmatpush1.msra.mxu0 %v175_v61  ;;  %713 = vmatpush1.msra.mxu1 %v177_v62  ;;  %v180_v61 = vld [vmem:[#allocation7 + $0x2e8] sm:$0xff]  ;;  %v182_v62 = vld [vmem:[#allocation7 + $0x2f8] sm:$0xff] }
  0x7f   :  { %643 = vmatprep.subr.mxu0 %v168_v63  ;;  %714 = vmatprep.subr.mxu1 %v170_v1  ;;  %v179_v63 = vld [vmem:[#allocation7 + $0x2e0] sm:$0xff]  ;;  %v181_v1 = vld [vmem:[#allocation7 + $0x2f0] sm:$0xff] }
  0x80   :  { %644 = vmatpush1.msra.mxu0 %v167_v2  ;;  %715 = vmatpush1.msra.mxu1 %v169_v3  ;;  %v172_v2 = vld [vmem:[#allocation7 + $0x2a8] sm:$0xff]  ;;  %v174_v3 = vld [vmem:[#allocation7 + $0x2b8] sm:$0xff] }
  0x81   :  { %645 = vmatprep.subr.mxu0 %v160_v4  ;;  %716 = vmatprep.subr.mxu1 %v162_v5  ;;  %v171_v4 = vld [vmem:[#allocation7 + $0x2a0] sm:$0xff]  ;;  %v173_v5 = vld [vmem:[#allocation7 + $0x2b0] sm:$0xff] }
  0x82   :  { %646 = vmatpush1.msra.mxu0 %v159_v6  ;;  %717 = vmatpush1.msra.mxu1 %v161_v7  ;;  %v164_v6 = vld [vmem:[#allocation7 + $0x268] sm:$0xff]  ;;  %v166_v7 = vld [vmem:[#allocation7 + $0x278] sm:$0xff] }
  0x83   :  { %647 = vmatprep.subr.mxu0 %v152_v8  ;;  %718 = vmatprep.subr.mxu1 %v154_v9  ;;  %v163_v8 = vld [vmem:[#allocation7 + $0x260] sm:$0xff]  ;;  %v165_v9 = vld [vmem:[#allocation7 + $0x270] sm:$0xff] }
  0x84   :  { %648 = vmatpush1.msra.mxu0 %v151_v10  ;;  %719 = vmatpush1.msra.mxu1 %v153_v11  ;;  %v156_v10 = vld [vmem:[#allocation7 + $0x228] sm:$0xff]  ;;  %v158_v11 = vld [vmem:[#allocation7 + $0x238] sm:$0xff] }
  0x85   :  { %649 = vmatprep.subr.mxu0 %v144_v12  ;;  %720 = vmatprep.subr.mxu1 %v146_v13  ;;  %v155_v12 = vld [vmem:[#allocation7 + $0x220] sm:$0xff]  ;;  %v157_v13 = vld [vmem:[#allocation7 + $0x230] sm:$0xff] }
  0x86   :  { %650 = vmatpush1.msra.mxu0 %v143_v14  ;;  %721 = vmatpush1.msra.mxu1 %v145_v15  ;;  %v148_v14 = vld [vmem:[#allocation7 + $0x1e8] sm:$0xff]  ;;  %v150_v15 = vld [vmem:[#allocation7 + $0x1f8] sm:$0xff] }
  0x87   :  { %651 = vmatprep.subr.mxu0 %v136_v16  ;;  %722 = vmatprep.subr.mxu1 %v138_v17  ;;  %v147_v16 = vld [vmem:[#allocation7 + $0x1e0] sm:$0xff]  ;;  %v149_v17 = vld [vmem:[#allocation7 + $0x1f0] sm:$0xff] }
  0x88   :  { %652 = vmatpush1.msra.mxu0 %v135_v18  ;;  %723 = vmatpush1.msra.mxu1 %v137_v19  ;;  %v140_v18 = vld [vmem:[#allocation7 + $0x1a8] sm:$0xff]  ;;  %v142_v19 = vld [vmem:[#allocation7 + $0x1b8] sm:$0xff] }
  0x89   :  { %653 = vmatprep.subr.mxu0 %v128_v20  ;;  %724 = vmatprep.subr.mxu1 %v130_v21  ;;  %v139_v20 = vld [vmem:[#allocation7 + $0x1a0] sm:$0xff]  ;;  %v141_v21 = vld [vmem:[#allocation7 + $0x1b0] sm:$0xff] }
  0x8a   :  { %654 = vmatpush1.msra.mxu0 %v127_v22  ;;  %725 = vmatpush1.msra.mxu1 %v129_v23  ;;  %v132_v22 = vld [vmem:[#allocation7 + $0x168] sm:$0xff]  ;;  %v134_v23 = vld [vmem:[#allocation7 + $0x178] sm:$0xff] }
  0x8b   :  { %655 = vmatprep.subr.mxu0 %v120_v24  ;;  %726 = vmatprep.subr.mxu1 %v122_v25  ;;  %v131_v24 = vld [vmem:[#allocation7 + $0x160] sm:$0xff]  ;;  %v133_v25 = vld [vmem:[#allocation7 + $0x170] sm:$0xff] }
  0x8c   :  { %656 = vmatpush1.msra.mxu0 %v119_v26  ;;  %727 = vmatpush1.msra.mxu1 %v121_v27  ;;  %v124_v26 = vld [vmem:[#allocation7 + $0x128] sm:$0xff]  ;;  %v126_v27 = vld [vmem:[#allocation7 + $0x138] sm:$0xff] }
  0x8d   :  { %657 = vmatprep.subr.mxu0 %v112_v28  ;;  %728 = vmatprep.subr.mxu1 %v114_v29  ;;  %v123_v28 = vld [vmem:[#allocation7 + $0x120] sm:$0xff]  ;;  %v125_v29 = vld [vmem:[#allocation7 + $0x130] sm:$0xff] }
  0x8e   :  { %658 = vmatpush1.msra.mxu0 %v111_v30  ;;  %729 = vmatpush1.msra.mxu1 %v113_v31  ;;  %v116_v30 = vld [vmem:[#allocation7 + $0xe8] sm:$0xff]  ;;  %v118_v31 = vld [vmem:[#allocation7 + $0xf8] sm:$0xff] }
  0x8f   :  { %659 = vmatprep.subr.mxu0 %v104_v32  ;;  %730 = vmatprep.subr.mxu1 %v106_v33  ;;  %v115_v32 = vld [vmem:[#allocation7 + $0xe0] sm:$0xff]  ;;  %v117_v33 = vld [vmem:[#allocation7 + $0xf0] sm:$0xff] }
  0x90   :  { %660 = vmatpush1.msra.mxu0 %v103_v34  ;;  %731 = vmatpush1.msra.mxu1 %v105_v35  ;;  %v108_v34 = vld [vmem:[#allocation7 + $0xa8] sm:$0xff]  ;;  %v110_v35 = vld [vmem:[#allocation7 + $0xb8] sm:$0xff] }
  0x91   :  { %661 = vmatprep.subr.mxu0 %v96_v36  ;;  %732 = vmatprep.subr.mxu1 %v98_v37  ;;  %v107_v36 = vld [vmem:[#allocation7 + $0xa0] sm:$0xff]  ;;  %v109_v37 = vld [vmem:[#allocation7 + $0xb0] sm:$0xff] }
  0x92   :  { %662 = vmatpush1.msra.mxu0 %v95_v38  ;;  %733 = vmatpush1.msra.mxu1 %v97_v39  ;;  %v100_v38 = vld [vmem:[#allocation7 + $0x68] sm:$0xff]  ;;  %v102_v39 = vld [vmem:[#allocation7 + $0x78] sm:$0xff] }
  0x93   :  { %663 = vmatprep.subr.mxu0 %v88_v40  ;;  %734 = vmatprep.subr.mxu1 %v90_v41  ;;  %v99_v40 = vld [vmem:[#allocation7 + $0x60] sm:$0xff]  ;;  %v101_v41 = vld [vmem:[#allocation7 + $0x70] sm:$0xff] }
  0x94   :  { %664 = vmatpush1.msra.mxu0 %v87_v42  ;;  %697 = vmatprep.mubr.f32.mxu0 %v1262_v0  ;;  %v92_v42 = vld [vmem:[#allocation7 + $0x28] sm:$0xff] }
  0x95   :  { %735 = vmatpush1.msra.mxu1 %v89_v43  ;;  %768 = vmatprep.mubr.f32.mxu1 %v1262_v0  ;;  %v94_v43 = vld [vmem:[#allocation7 + $0x38] sm:$0xff] }
  0x96   :  { %698 = vmatmul.mubr.f32.vlgmr.msra.gmra.mxu0 %v1337_v44  ;;  %769 = vmatmul.mubr.f32.vlgmr.msra.gmra.mxu1 %v1337_v44 }
  0x97   :  { %775 = vmatprep.subr.mxu0 %v212_v45  ;;  %846 = vmatprep.subr.mxu1 %v214_v46  ;;  %v91_v45 = vld [vmem:[#allocation7 + $0x20] sm:$0xff]  ;;  %v93_v46 = vld [vmem:[#allocation7 + $0x30] sm:$0xff] }
  0x98   :  { %776 = vmatpush1.msra.mxu0 %v211_v47  ;;  %847 = vmatpush1.msra.mxu1 %v213_v48 }
  0x99   :  { %777 = vmatprep.subr.mxu0 %v204_v49  ;;  %848 = vmatprep.subr.mxu1 %v206_v50 }
  0x9a   :  { %778 = vmatpush1.msra.mxu0 %v203_v51  ;;  %849 = vmatpush1.msra.mxu1 %v205_v52 }
  0x9b   :  { %779 = vmatprep.subr.mxu0 %v196_v54  ;;  %850 = vmatprep.subr.mxu1 %v198_v55  ;;  %v919_v54 = vlaneseq }
  0x9c   :  { %780 = vmatpush1.msra.mxu0 %v195_v56  ;;  %851 = vmatpush1.msra.mxu1 %v197_v57 }
  0x9d   :  { %781 = vmatprep.subr.mxu0 %v188_v53  ;;  %852 = vmatprep.subr.mxu1 %v190_v58  ;;  %v1355_v57 = vshrl.u32 %v919_v54, 7 }
  0x9e   :  { %782 = vmatpush1.msra.mxu0 %v187_v59  ;;  %853 = vmatpush1.msra.mxu1 %v189_v60 }
  0x9f   :  { %783 = vmatprep.subr.mxu0 %v180_v61  ;;  %854 = vmatprep.subr.mxu1 %v182_v62  ;;  %v937_v58 = vsub.s32 4, %v1355_v57  ;;  %v941_v59 = vsub.s32 5, %v1355_v57  ;;  %v949_v60 = vsub.s32 7, %v1355_v57  ;;  %v917_v61 = vld [vmem:[#allocation10] sm:$0xff] }
  0xa0   :  { %784 = vmatpush1.msra.mxu0 %v179_v63  ;;  %855 = vmatpush1.msra.mxu1 %v181_v1  ;;  %v1364_v1 = vld [vmem:[%s1391_s5] sm:$0xff]  ;;  %s1264_s5 = smov [#allocation11]  }
  0xa1   :  { %785 = vmatprep.subr.mxu0 %v172_v2  ;;  %856 = vmatprep.subr.mxu1 %v174_v3  ;;  %v938_v2 = vrot.slane %v917_v61, %v937_v58  ;;  %s1074_s21 = sshll.u32 %s1264_s5, 4  ;;  %s1075_s21 = int_to_ptr.vmem [resolvable:$true] %s1074_s21 }
  0xa2   :  { %786 = vmatpush1.msra.mxu0 %v171_v4  ;;  %857 = vmatpush1.msra.mxu1 %v173_v5  ;;  %v988_v5 = vrot.slane %v1364_v1, %v937_v58  ;;  %s1227_s22 = scalar_lea.vmem %s1075_s21, 128  ;;  %p1232_p12 = scmp.lt.s32.totalorder %s1075_s21, %s1075_s21 }
  0xa3   :  { %787 = vmatprep.subr.mxu0 %v164_v6  ;;  %858 = vmatprep.subr.mxu1 %v166_v7  ;;  %p1228_p11 = scmp.ne.s32.totalorder %s1075_s21, %s1227_s22  ;;  %p1233_p13 = scmp.lt.s32.totalorder %s1227_s22, %s1227_s22 }
  0xa4   :  { %788 = vmatpush1.msra.mxu0 %v163_v8  ;;  %859 = vmatpush1.msra.mxu1 %v165_v9 }
  0xa5   :  { %789 = vmatprep.subr.mxu0 %v156_v10  ;;  %860 = vmatprep.subr.mxu1 %v158_v11  ;;  %v942_v10 = vrot.slane %v917_v61, %v941_v59  ;;  %v950_v11 = vrot.slane %v917_v61, %v949_v60  ;;  %p1234_p0 = por %p1233_p13, %p1232_p12 }
  0xa6   :  { %790 = vmatpush1.msra.mxu0 %v155_v12  ;;  %861 = vmatpush1.msra.mxu1 %v157_v13  ;;  %v992_v13 = vrot.slane %v1364_v1, %v941_v59 }
  0xa7   :  { %791 = vmatprep.subr.mxu0 %v148_v14  ;;  %862 = vmatprep.subr.mxu1 %v150_v15  ;;  %v1000_v15 = vrot.slane %v1364_v1, %v949_v60  ;;  %p1235_p1 = pnand %p1234_p0, %p1228_p11 }
  0xa8   :  { %792 = vmatpush1.msra.mxu0 %v147_v16  ;;  %863 = vmatpush1.msra.mxu1 %v149_v17 }
  0xa9   :  { %793 = vmatprep.subr.mxu0 %v140_v18  ;;  %864 = vmatprep.subr.mxu1 %v142_v19 }
  0xaa   :  { %794 = vmatpush1.msra.mxu0 %v139_v20  ;;  %865 = vmatpush1.msra.mxu1 %v141_v21 }
  0xab   :  { %795 = vmatprep.subr.mxu0 %v132_v22  ;;  %866 = vmatprep.subr.mxu1 %v134_v23 }
  0xac   :  { %796 = vmatpush1.msra.mxu0 %v131_v24  ;;  %867 = vmatpush1.msra.mxu1 %v133_v25 }
  0xad   :  { %797 = vmatprep.subr.mxu0 %v124_v26  ;;  %868 = vmatprep.subr.mxu1 %v126_v27 }
  0xae   :  { %798 = vmatpush1.msra.mxu0 %v123_v28  ;;  %869 = vmatpush1.msra.mxu1 %v125_v29 }
  0xaf   :  { %799 = vmatprep.subr.mxu0 %v116_v30  ;;  %870 = vmatprep.subr.mxu1 %v118_v31 }
  0xb0   :  { %800 = vmatpush1.msra.mxu0 %v115_v32  ;;  %871 = vmatpush1.msra.mxu1 %v117_v33 }
  0xb1   :  { %801 = vmatprep.subr.mxu0 %v108_v34  ;;  %872 = vmatprep.subr.mxu1 %v110_v35 }
  0xb2   :  { %802 = vmatpush1.msra.mxu0 %v107_v36  ;;  %873 = vmatpush1.msra.mxu1 %v109_v37 }
  0xb3   :  { %803 = vmatprep.subr.mxu0 %v100_v38  ;;  %874 = vmatprep.subr.mxu1 %v102_v39  ;;  %v921_v38 = vsub.s32 0, %v1355_v57  ;;  %v925_v39 = vsub.s32 1, %v1355_v57 }
  0xb4   :  { %804 = vmatpush1.msra.mxu0 %v99_v40  ;;  %875 = vmatpush1.msra.mxu1 %v101_v41  ;;  %v929_v40 = vsub.s32 2, %v1355_v57  ;;  %v933_v41 = vsub.s32 3, %v1355_v57 }
  0xb5   :  { %805 = vmatprep.subr.mxu0 %v92_v42  ;;  %876 = vmatprep.subr.mxu1 %v94_v43  ;;  %v922_v43 = vrot.slane %v917_v61, %v921_v38  ;;  %v972_v59 = vrot.slane %v1364_v1, %v921_v38 }
  0xb6   :  { %806 = vmatpush1.msra.mxu0 %v91_v45  ;;  %839 = vmatprep.mubr.f32.mxu0 %v1262_v0 }
  0xb7   :  { %877 = vmatpush1.msra.mxu1 %v93_v46  ;;  %910 = vmatprep.mubr.f32.mxu1 %v1262_v0  ;;  %v926_v46 = vrot.slane %v917_v61, %v925_v39 }
  0xb8   :  { %840 = vmatmul.mubr.f32.vlgmr.msra.gmra.mxu0 %v1337_v44  ;;  %911 = vmatmul.mubr.f32.vlgmr.msra.gmra.mxu1 %v1337_v44  ;;  %v945_v44 = vsub.s32 6, %v1355_v57 }
  0xba   :  { %v946_v3 = vrot.slane %v917_v61, %v945_v44  ;;  %v996_v7 = vrot.slane %v1364_v1, %v945_v44 }
 0x118   :  { %v1347_v47 = vpop.f32.mrf.mxu0  ;;  %v1349_v48 = vpop.f32.mrf.mxu1 }
 0x11a   :  { %v1351_v49 = vpop.f32.mrf.mxu0  ;;  %v1353_v50 = vpop.f32.mrf.mxu1 }
 0x134   :  { %v557_v51 = vpop.f32.mrf.mxu0  ;;  %v628_v52 = vpop.f32.mrf.mxu1 }
 0x136   :  { %v559_v55 = vpop.f32.mrf.mxu0  ;;  %v630_v56 = vpop.f32.mrf.mxu1 }
 0x156   :  { %v699_v0 = vpop.f32.mrf.mxu0  ;;  %v770_v53 = vpop.f32.mrf.mxu1 }
 0x157   :  { %v700_v42 = vadd.f32 %v699_v0, %v1347_v47  ;;  %v980_v47 = vrot.slane %v1364_v1, %v929_v40 }
 0x158   :  { %v701_v62 = vpop.f32.mrf.mxu0  ;;  %v772_v63 = vpop.f32.mrf.mxu1 }
 0x159   :  { %v702_v45 = vadd.f32 %v701_v62, %v1351_v49  ;;  %v773_v54 = vadd.f32 %v772_v63, %v1353_v50  ;;  %v959_v44 = vmul.f32 %v922_v43, %v700_v42  ;;  %v984_v49 = vrot.slane %v1364_v1, %v933_v41 }
 0x15b   :  { %v960_v60 = vmul.f32 %v926_v46, %v702_v45 }
 0x178   :  { %v841_v4 = vpop.f32.mrf.mxu0  ;;  %v912_v6 = vpop.f32.mrf.mxu1 }
 0x179   :  { %v842_v8 = vadd.f32 %v841_v4, %v557_v51  ;;  %v913_v9 = vadd.f32 %v912_v6, %v628_v52  ;;  %v771_v51 = vadd.f32 %v770_v53, %v1349_v48  ;;  %v930_v52 = vrot.slane %v917_v61, %v929_v40 }
 0x17a   :  { %v843_v12 = vpop.f32.mrf.mxu0  ;;  %v914_v14 = vpop.f32.mrf.mxu1  ;;  %v1009_v4 = vadd.f32 %v972_v59, %v959_v44 }
 0x17b   :  { %v963_v16 = vmul.f32 %v938_v2, %v842_v8  ;;  %v965_v17 = vmul.f32 %v946_v3, %v913_v9  ;;  %v844_v18 = vadd.f32 %v843_v12, %v559_v55  ;;  %v915_v19 = vadd.f32 %v914_v14, %v630_v56 }
 0x17c   :  { %v934_v55 = vrot.slane %v917_v61, %v933_v41  ;;  %v1263_v56 = vmov 1983009808   ;;  %v976_v2 = vrot.slane %v1364_v1, %v925_v39  ;;  %v961_v3 = vmul.f32 %v930_v52, %v771_v51 }
 0x17d   :  { %v1013_v20 = vadd.f32 %v988_v5, %v963_v16  ;;  %v1015_v21 = vadd.f32 %v996_v7, %v965_v17  ;;  %v964_v22 = vmul.f32 %v942_v10, %v844_v18  ;;  %v966_v23 = vmul.f32 %v950_v11, %v915_v19 }
 0x17e   :  { %v1052_v58 = vunpack.c.l.s4 %v1263_v56  ;;  %v962_v0 = vmul.f32 %v934_v55, %v773_v54  ;;  %v1010_v50 = vadd.f32 %v976_v2, %v960_v60  ;;  %v1011_v63 = vadd.f32 %v980_v47, %v961_v3 }
 0x17f   :  { %v1097_v24 = vmul.f32 -1.442695, %v1013_v20  ;;  %v1099_v25 = vmul.f32 -1.442695, %v1015_v21  ;;  %v1014_v26 = vadd.f32 %v992_v13, %v964_v22  ;;  %v1016_v27 = vadd.f32 %v1000_v15, %v966_v23 }
 0x180   :  { %v1053_v62 = vunpack.c.0.s8 %v1052_v58  ;;  %v1012_v5 = vadd.f32 %v984_v49, %v962_v0 }
 0x181   :  { %1111 = vpow2.f32 %v1097_v24  ;;  %v1098_v28 = vmul.f32 -1.442695, %v1014_v26  ;;  %v1100_v29 = vmul.f32 -1.442695, %v1016_v27 }
 0x182   :  { %1113 = vpow2.f32 %v1099_v25  ;;  %v1056_v9 = vsub.s32 %v1053_v62, %v1355_v57 }
 0x183   :  { %1115 = vpow2.f32 %v1098_v28 }
 0x184   :  { %1117 = vpow2.f32 %v1100_v29 }
 0x18e   :  { %v1112_v30 = vpop.eup %1111 }
 0x18f   :  { %v1114_v31 = vpop.eup %1113  ;;  %v1029_v32 = vadd.f32 1.0, %v1112_v30 }
 0x190   :  { %v1116_v33 = vpop.eup %1115  ;;  %v1031_v34 = vadd.f32 1.0, %v1114_v31 }
 0x191   :  { %v1118_v35 = vpop.eup %1117  ;;  %1119 = vrcp.f32 %v1029_v32  ;;  %v1030_v36 = vadd.f32 1.0, %v1116_v33 }
 0x192   :  { %1121 = vrcp.f32 %v1031_v34  ;;  %v1032_v37 = vadd.f32 1.0, %v1118_v35 }
 0x193   :  { %1123 = vrcp.f32 %v1030_v36 }
 0x194   :  { %1125 = vrcp.f32 %v1032_v37 }
 0x19e   :  { %v1120_v48 = vpop.eup %1119 }
 0x19f   :  { %v1122_v53 = vpop.eup %1121  ;;  %v1041_v7 = vmul.f32 %v1120_v48, %v1009_v4 }
 0x1a0   :  { %v1124_v61 = vpop.eup %1123  ;;  %v1043_v10 = vmul.f32 %v1122_v53, %v1011_v63 }
 0x1a1   :  { %v1126_v6 = vpop.eup %1125  ;;  %v1042_v8 = vmul.f32 %v1124_v61, %v1010_v50 }
 0x1a2   :  { %v1044_v11 = vmul.f32 %v1126_v6, %v1012_v5 }
 0x1a3   :  { %v1049_v12 = vcombine.low %v1041_v7, %v1042_v8 }
 0x1a4   :  { %v1050_v13 = vcombine.low %v1043_v10, %v1044_v11 }
 0x1a5   :  { %v1057_v14 = vrot.slane %v1049_v12, %v1056_v9 }
 0x1a6   :  { %v1064_v1 = vrot.slane %v1050_v13, %v1056_v9 }
 0x1a8   :  { %v1065_v15 = vcombine.low %v1057_v14, %v1064_v1 }
 0x1aa   :  { %1067 = vst [vmem:[#allocation11] sm:$0xff] %v1065_v15 }
 0x1ab   :  { %1238 = shalt.err (!%p1235_p1)
}
 0x1ac   :  { %1077 = dma.vmem_to_hbm [thread:$0]  %s1075_s21, 128, %s1392_s6, [#allocation4]  }
 0x1ad   :  { %1253 = dma.done.wait [#allocation4], 128  }
 0x1ae   :  { %1254 = vsyncadd [#allocation4], 4294967168 }
 0x1af   :  { %1081 = vsyncpa [#allocation3], 1 }
 0x1b0   :  { %1082 = vsyncpa [#allocation6], 1 }
 0x1b1   :  { %1083 = vsyncpa [#allocation9], 1 }
 0x1b2   :  { %1084 = vsyncpa [#allocation4], 1 }

</bundles_post_ra>
